<compile_context>
chip_gen: v7x
topology: tpu7x:2x2x1
jax: 0.10.0
libtpu: 0.0.40
codegen_flags: <defaults>
</compile_context>

<pallas_src>
import functools

import jax
import jax.numpy as jnp
from jax.experimental import pallas as pl
from jax.experimental.pallas import tpu as pltpu


def _round_up(n, m):
    return (n + m - 1) // m * m


def _full_spec(shape):
    nd = len(shape)
    return pl.BlockSpec(shape, lambda *_: (0,) * nd)


# -----------------------------------------------------------------------------
# One-time probe of pltpu.roll's rotate convention (run OUTSIDE jit).  The
# causal shift only needs "element j -> j+shift"; probing keeps the kernel
# robust to either convention at zero hot-path cost.
# -----------------------------------------------------------------------------
def probe_roll_is_forward():
    def _k(x_ref, o_ref):
        o_ref[...] = pltpu.roll(x_ref[...], shift=1, axis=1)

    x = jnp.arange(8 * 128, dtype=jnp.float32).reshape(8, 128)
    y = pl.pallas_call(_k, out_shape=jax.ShapeDtypeStruct((8, 128),
                                                          jnp.float32))(x)
    return bool(y[0, 1] == x[0, 0])


# ------------------------- one-time weight preparation ------------------------

def prepare_params(params, *, kernel_size, compute_dtype=jnp.bfloat16):
    """One-time weight packing: channel padding to sublane multiples, per-tap
    conv matrices, head linear1 split, bf16 storage of MXU operands.  Call once
    and pass the result into the jitted forward (hoisted out of the per-call
    path per the perf review).  Padded rows/cols are zero, so padded channels
    stay exactly zero through conv / bias / ReLU / residual and the head."""
    K = kernel_size
    cdt = compute_dtype

    def pad2(w, r, c):
        w = jnp.asarray(w, jnp.float32)
        return jnp.pad(w, ((0, r - w.shape[0]), (0, c - w.shape[1])))

    def colb(b, r):                       # bias as an (r, 1) f32 column
        b = jnp.asarray(b, jnp.float32)
        return jnp.pad(b, (0, r - b.shape[0])).reshape(r, 1)

    c_in = params['tcn'][0]['w1'].shape[2]
    layers, dils, has_ds = [], [], []
    prev, prev_pad = c_in, _round_up(c_in, 8)
    for i, blk in enumerate(params['tcn']):
        out_c = blk['w1'].shape[1]
        out_pad = _round_up(out_c, 8)
        lay = {
            'w1': jnp.stack([pad2(blk['w1'][k], out_pad, prev_pad)
                             for k in range(K)]).astype(cdt),
            'b1': colb(blk['b1'], out_pad),
            'w2': jnp.stack([pad2(blk['w2'][k], out_pad, out_pad)
                             for k in range(K)]).astype(cdt),
            'b2': colb(blk['b2'], out_pad),
        }
        if 'wd' in blk:
            lay['wd'] = pad2(blk['wd'], out_pad, prev_pad).astype(cdt)
            lay['bd'] = colb(blk['bd'], out_pad)
        layers.append(lay)
        dils.append(2 ** i)
        has_ds.append('wd' in blk)
        prev, prev_pad = out_c, out_pad

    C, C_pad = prev, prev_pad
    hd = params['head']
    A = hd['ant_w1'].shape[1]
    A_pad = _round_up(A, 8)
    H = hd['ant_w1'].shape[0]                 # 10
    H_pad = _round_up(H, 8)                   # 16
    O = hd['w3'].shape[0]
    head = {
        'aw1': pad2(hd['ant_w1'], H_pad, A_pad).astype(cdt),
        'ab1': colb(hd['ant_b1'], H_pad),
        'aw2': pad2(hd['ant_w2'], H_pad, H_pad).astype(cdt),
        'ab2': colb(hd['ant_b2'], H_pad),
        # linear1 split into TCN part / antagonist part -> no in-kernel concat
        'w1y': pad2(hd['w1'][:, :C], C_pad, C_pad).astype(cdt),
        'w1a': pad2(hd['w1'][:, C:], C_pad, H_pad).astype(cdt),
        'b1': colb(hd['b1'], C_pad),
        'w2': pad2(hd['w2'], C_pad, C_pad).astype(cdt),
        'b2': colb(hd['b2'], C_pad),
        'w3': pad2(hd['w3'], O, C_pad).astype(cdt),
        'b3': colb(hd['b3'], O),
    }
    packed = {'layers': layers, 'head': head}
    cfg = dict(K=K, dilations=tuple(dils), has_ds=tuple(has_ds),
               c_in=c_in, c_in_pad=_round_up(c_in, 8),
               c_ant=A, c_ant_pad=A_pad, C_pad=C_pad, O=O,
               compute_dtype=cdt)
    return packed, cfg


# ------------------------------- fused kernel ---------------------------------

def _make_kernel(cfg, T, L, roll_forward):
    K = cfg['K']
    dils = cfg['dilations']
    has_ds = cfg['has_ds']
    cdt = cfg['compute_dtype']

    def kernel(*refs):
        it = iter(refs)
        x_ref = next(it)          # (1, c_in_pad, L)  f32
        ant_ref = next(it)        # (1, c_ant_pad, L) f32
        t_ref = next(it)          # (1, L) int32: time index within each segment
        layer_refs = []
        for ds in has_ds:
            w1 = next(it); b1 = next(it); w2 = next(it); b2 = next(it)
            wd, bd = (next(it), next(it)) if ds else (None, None)
            layer_refs.append((w1, b1, w2, b2, wd, bd))
        aw1 = next(it); ab1 = next(it)
        aw2 = next(it); ab2 = next(it)
        w1y = next(it); w1a = next(it); hb1 = next(it)
        hw2 = next(it); hb2 = next(it)
        hw3 = next(it); hb3 = next(it)
        o_ref = next(it)

        dot = functools.partial(jnp.dot, preferred_element_type=jnp.float32)
        t_idx = t_ref[...]                                   # (1, L)

        def shifted_tap(v32, s):
            # v32[:, j] <- v32[:, j - s] where (j % T) >= s, else 0.
            # XLU lane roll + VPU mask: replaces the old pad-to-(T+p) +
            # sublane-concat im2col slab.  Circular wrap-around and
            # cross-batch-segment spill are killed by the mask.
            amt = s if roll_forward else L - s
            rolled = pltpu.roll(v32, shift=amt, axis=1)
            return jnp.where(t_idx >= s, rolled, 0.0)

        def causal_conv(v32, w_ref, b_ref, d):
            # v32: (c_in_pad, L) f32.  K accumulated MXU taps with bf16
            # operands and f32 accumulation; no stacked-weight slab.
            acc = None
            for k in range(K):
                s = (K - 1 - k) * d
                if s >= T:            # tap reads only the causal zero padding
                    continue
                vk = (v32 if s == 0 else shifted_tap(v32, s)).astype(cdt)
                term = dot(w_ref[k], vk)
                acc = term if acc is None else acc + term
            return acc + b_ref[...]                           # f32 bias

        # -------- stacked TemporalBlocks (dropout == identity at eval) -------
        y = x_ref[0]                                          # (c_pad, L) f32
        for (w1, b1, w2, b2, wd, bd), d in zip(layer_refs, dils):
            h = jnp.maximum(causal_conv(y, w1, b1, d), 0.0)
            out = jnp.maximum(causal_conv(h, w2, b2, d), 0.0)
            if wd is not None:
                res = dot(wd[...], y.astype(cdt)) + bd[...]   # 1x1 downsample
            else:
                res = y
            y = jnp.maximum(out + res, 0.0)

        # -------- antagonist MLP head, evaluated on every lane ---------------
        # Columns with t < eff_hist and padded batch segments are discarded by
        # the host on the tiny output; evaluating them here keeps all 128
        # lanes busy and avoids in-kernel lane-offset slices entirely.
        yc = y.astype(cdt)
        ac = ant_ref[0].astype(cdt)
        a = jnp.maximum(dot(aw1[...], ac) + ab1[...], 0.0)
        a = jnp.maximum(dot(aw2[...], a.astype(cdt)) + ab2[...], 0.0)
        z = jnp.maximum(dot(w1y[...], yc) + dot(w1a[...], a.astype(cdt))
                        + hb1[...], 0.0)
        z = jnp.maximum(dot(hw2[...], z.astype(cdt)) + hb2[...], 0.0)
        o_ref[0] = dot(hw3[...], z.astype(cdt)) + hb3[...]

    return kernel


# ------------------------------ fused forward ---------------------------------

def ant_tcn_forward(packed, x, x_ant, *, cfg, eff_hist, roll_forward=None,
                    batch_block=None):
    """Fused AntTCN forward.  x: (B, C_in, T) f32, x_ant: (B, C_ant, T) f32.
    Returns (B*(T-eff_hist), output_size) f32, rows batch-major then time,
    matching AntTCN.forward_pass."""
    if roll_forward is None:
        # Must be resolved OUTSIDE jit (it runs a tiny probe kernel).
        roll_forward = probe_roll_is_forward()

    B, c_in, T = x.shape
    assert c_in == cfg['c_in'] and x_ant.shape[1] == cfg['c_ant']
    assert T > eff_hist
    Te = T - eff_hist
    O = cfg['O']

    # Lane-dense batch packing: put Bblk batch segments side by side on the
    # lane axis so activations are (channels, Bblk*T) with Bblk*T == 128 here.
    # Extra (zero) segments are free -- those lanes would otherwise sit idle --
    # and they make every roll / MXU pass / store full-width.  At production
    # T >= 128, tile T with a (K-1)*d_max halo instead and keep Bblk == 1.
    if batch_block is None:
        batch_block = max(1, 128 // T) if T <= 128 else 1
    Bblk = batch_block
    G = -(-B // Bblk)
    B_pad = G * Bblk
    L = Bblk * T

    c_in_pad, c_ant_pad = cfg['c_in_pad'], cfg['c_ant_pad']

    def pack(v, c_pad):
        # (B, c, T) -> (G, c_pad, Bblk*T), zero-padding channels and batch.
        Bv, cv, Tv = v.shape
        v = jnp.pad(v, ((0, B_pad - Bv), (0, c_pad - cv), (0, 0)))
        return (v.reshape(G, Bblk, c_pad, Tv)
                 .transpose(0, 2, 1, 3)
                 .reshape(G, c_pad, Bblk * Tv))

    x_p = pack(x, c_in_pad)
    a_p = pack(x_ant, c_ant_pad)
    # Per-lane "time within batch segment" index, used for the causal masks.
    t_map = jnp.tile(jnp.arange(T, dtype=jnp.int32), Bblk).reshape(1, L)

    inputs = [x_p, a_p, t_map]
    in_specs = [pl.BlockSpec((1, c_in_pad, L), lambda g: (g, 0, 0)),
                pl.BlockSpec((1, c_ant_pad, L), lambda g: (g, 0, 0)),
                _full_spec((1, L))]

    for lay, ds in zip(packed['layers'], cfg['has_ds']):
        arrs = [lay['w1'], lay['b1'], lay['w2'], lay['b2']]
        if ds:
            arrs += [lay['wd'], lay['bd']]
        inputs += arrs
        in_specs += [_full_spec(a.shape) for a in arrs]

    hd = packed['head']
    head_arrs = [hd['aw1'], hd['ab1'], hd['aw2'], hd['ab2'],
                 hd['w1y'], hd['w1a'], hd['b1'],
                 hd['w2'], hd['b2'], hd['w3'], hd['b3']]
    inputs += head_arrs
    in_specs += [_full_spec(a.shape) for a in head_arrs]

    # TODO(synk): at production scale single-buffer the grid-invariant weight
    # specs (pl.Buffered(1)) or stage them once via a manual DMA to halve the
    # weight VMEM footprint on v7x (64 MiB VMEM).
    out = pl.pallas_call(
        _make_kernel(cfg, T, L, roll_forward),
        out_shape=jax.ShapeDtypeStruct((G, O, L), jnp.float32),
        grid=(G,),
        in_specs=in_specs,
        out_specs=pl.BlockSpec((1, O, L), lambda g: (g, 0, 0)),
        compiler_params=pltpu.CompilerParams(
            dimension_semantics=("parallel",),        # megacore-shardable
            vmem_limit_bytes=32 * 1024 * 1024),       # explicit VMEM budget
    )(*inputs)

    # (G, O, Bblk*T) -> (B*Te, O).  This output-side selection/transpose is a
    # few KB and is left to XLA so the in-kernel store stays lane-dense.
    out = (out.reshape(G, O, Bblk, T)
              .transpose(0, 2, 3, 1)
              .reshape(B_pad, T, O))
    return out[:B, eff_hist:, :].reshape(B * Te, O)


# ------------------------------- parameter init -------------------------------

def init_params(key, input_size, input_size_ant, output_size, num_channels,
                kernel_size):
    keys = iter(jax.random.split(key, 64))

    def nrm(shape, s=0.01):
        return (s * jax.random.normal(next(keys), shape)).astype(jnp.float32)

    tcn = []
    in_c = input_size
    for out_c in num_channels:
        blk = {
            # PyTorch Conv1d weight (out, in, K) -> stored as (K, out, in)
            'w1': jnp.transpose(nrm((out_c, in_c, kernel_size)), (2, 0, 1)),
            'b1': nrm((out_c,), 0.1),
            'w2': jnp.transpose(nrm((out_c, out_c, kernel_size)), (2, 0, 1)),
            'b2': nrm((out_c,), 0.1),
        }
        if in_c != out_c:
            blk['wd'] = nrm((out_c, in_c))
            blk['bd'] = nrm((out_c,), 0.1)
        in_c = out_c
        tcn.append(blk)

    C = num_channels[-1]
    head = {
        'ant_w1': nrm((10, input_size_ant)), 'ant_b1': nrm((10,), 0.1),
        'ant_w2': nrm((10, 10)),             'ant_b2': nrm((10,), 0.1),
        'w1': nrm((C, C + 10)),              'b1': nrm((C,), 0.1),
        'w2': nrm((C, C)),                   'b2': nrm((C,), 0.1),
        'w3': nrm((output_size, C)),         'b3': nrm((output_size,), 0.1),
    }
    return {'tcn': tcn, 'head': head}


# ------------------------------ pure-JAX reference -----------------------------

def ref_forward(params, x, x_ant, *, kernel_size, eff_hist):
    K = kernel_size
    y = x
    for i, blk in enumerate(params['tcn']):
        d = 2 ** i
        p = (K - 1) * d
        _, _, T = y.shape

        def conv(inp, w, b):
            xp = jnp.pad(inp, ((0, 0), (0, 0), (p, 0)))
            acc = 0.0
            for k in range(K):
                acc = acc + jnp.einsum('oc,bct->bot', w[k],
                                       xp[:, :, k * d:k * d + T])
            return acc + b[None, :, None]

        h = jax.nn.relu(conv(y, blk['w1'], blk['b1']))
        out = jax.nn.relu(conv(h, blk['w2'], blk['b2']))
        if 'wd' in blk:
            res = jnp.einsum('oc,bct->bot', blk['wd'], y) + blk['bd'][None, :, None]
        else:
            res = y
        y = jax.nn.relu(out + res)

    B, C, T = y.shape
    N = B * (T - eff_hist)
    yf = jnp.transpose(y[:, :, eff_hist:], (0, 2, 1)).reshape(N, C)
    af = jnp.transpose(x_ant[:, :, eff_hist:], (0, 2, 1)).reshape(N, -1)
    hd = params['head']
    a = jax.nn.relu(af @ hd['ant_w1'].T + hd['ant_b1'])
    a = jax.nn.relu(a @ hd['ant_w2'].T + hd['ant_b2'])
    z = jnp.concatenate([yf, a], axis=1)
    z = jax.nn.relu(z @ hd['w1'].T + hd['b1'])
    z = jax.nn.relu(z @ hd['w2'].T + hd['b2'])
    return z @ hd['w3'].T + hd['b3']


if __name__ == "__main__":
    B, T = 2, 16
    input_size, input_size_ant, output_size = 6, 4, 3
    num_channels = [8, 8]
    kernel_size = 2
    dropout = 0.2          # identity at inference
    eff_hist = 6           # history samples dropped before the head

    key = jax.random.PRNGKey(0)
    kp, kx, ka = jax.random.split(key, 3)
    params = init_params(kp, input_size, input_size_ant, output_size,
                         num_channels, kernel_size)
    x = jax.random.normal(kx, (B, input_size, T), jnp.float32)
    x_ant = jax.random.normal(ka, (B, input_size_ant, T), jnp.float32)

    roll_forward = probe_roll_is_forward()          # one-time, outside jit
    ref = ref_forward(params, x, x_ant, kernel_size=kernel_size,
                      eff_hist=eff_hist)

    # --- f32 variant: exact structural check against the pure-JAX reference ---
    packed32, cfg32 = prepare_params(params, kernel_size=kernel_size,
                                     compute_dtype=jnp.float32)
    fwd32 = jax.jit(functools.partial(ant_tcn_forward, cfg=cfg32,
                                      eff_hist=eff_hist,
                                      roll_forward=roll_forward))
    out32 = jax.block_until_ready(fwd32(packed32, x, x_ant))
    assert out32.shape == (B * (T - eff_hist), output_size), out32.shape
    assert jnp.allclose(out32, ref, atol=1e-4, rtol=1e-4), \
        float(jnp.max(jnp.abs(out32 - ref)))

    # --- bf16-MXU variant (the performance default on v5e/v6e/v7x) ------------
    packed16, cfg16 = prepare_params(params, kernel_size=kernel_size,
                                     compute_dtype=jnp.bfloat16)
    fwd16 = jax.jit(functools.partial(ant_tcn_forward, cfg=cfg16,
                                      eff_hist=eff_hist,
                                      roll_forward=roll_forward))
    out16 = jax.block_until_ready(fwd16(packed16, x, x_ant))
    assert out16.shape == ref.shape
    assert jnp.allclose(out16, ref, atol=1e-2, rtol=1e-2), \
        float(jnp.max(jnp.abs(out16 - ref)))

    print("KERNEL_OK")
</pallas_src>

<mosaic_0001>
module attributes {stable_mosaic.version = 11 : i64} {
  func.func @_k(%arg0: memref<8x128xf32, #tpu.memory_space<vmem>>, %arg1: memref<8x128xf32, #tpu.memory_space<vmem>>) attributes {dimension_semantics = [], scalar_prefetch = 0 : i64, scratch_operands = 0 : i64, tpu.core_type = #tpu.core_type<tc>} {
    %c0 = arith.constant 0 : index
    %c0_0 = arith.constant 0 : index
    %0 = vector.load %arg0[%c0, %c0_0] : memref<8x128xf32, #tpu.memory_space<vmem>>, vector<8x128xf32>
    %c1_i32 = arith.constant 1 : i32
    %1 = tpu.dynamic_rotate %0 by %c1_i32 dim 1 : vector<8x128xf32>, i32 -> vector<8x128xf32>
    %c0_1 = arith.constant 0 : index
    %c0_2 = arith.constant 0 : index
    %2 = vector.load %arg1[%c0_1, %c0_2] : memref<8x128xf32, #tpu.memory_space<vmem>>, vector<8x128xf32>
    tpu.vector_store %arg1[%c0_1, %c0_2], %1 {strides = array<i32>} : memref<8x128xf32, #tpu.memory_space<vmem>>, vector<8x128xf32>,
    return
  }
}

</mosaic_0001>

<bundles_post_ra>
// kernel: tpu_custom_call.1
= control target key start
LH: loop header
LB: loop body
LE: loop exit
PB: predicated region body
PF: predicated region fallthrough
CT: control target
= control target key end

     0   :  { %6 = vsyncpa [#allocation3], 0  ;;  %s128_s0 = inlined_call_operand.hbm [shape: f32[8,128], index: 0, kind: input, shape index: {}]   ;;  %s129_s1 = inlined_call_operand.hbm [shape: f32[8,128], index: 1, kind: output, shape index: {}]  }
   0x1   :  { %7 = vsyncpa [#allocation4], 0  ;;  %s91_s6 = smov [#allocation2]   ;;  %s43_s10 = scalar_lea.hbm %s128_s0, 128 }
   0x2   :  { %s14_s7 = sshll.u32 %s91_s6, 4  ;;  %p44_p0 = scmp.ne.s32.totalorder %s128_s0, %s43_s10  ;;  %s15_s7 = int_to_ptr.vmem [resolvable:$true] %s14_s7 }
   0x3   :  { %p47_p1 = scmp.lt.u32.totalorder %s43_s10, %s128_s0 }
   0x5   :  { %p49_p2 = pnand %p47_p1, %p44_p0 }
   0x7   :  { %52 = shalt.err (!%p49_p2)
}
   0x8   :  { %s53_s15 = scalar_lea.vmem %s15_s7, 128  ;;  %p58_p4 = scmp.lt.s32.totalorder %s15_s7, %s15_s7 }
   0x9   :  { %p54_p3 = scmp.ne.s32.totalorder %s15_s7, %s53_s15  ;;  %p59_p5 = scmp.lt.s32.totalorder %s53_s15, %s53_s15 }
   0xb   :  { %p60_p6 = por %p59_p5, %p58_p4 }
   0xd   :  { %p61_p7 = pnand %p60_p6, %p54_p3 }
   0xf   :  { %64 = shalt.err (!%p61_p7)
}
  0x10   :  { %17 = dma.hbm_to_vmem [thread:$0]  %s128_s0, 128, %s15_s7, [#allocation3]  }
  0x11   :  { %87 = dma.done.wait [#allocation3], 128  }
  0x12   :  { %88 = vsyncadd [#allocation3], 4294967168  ;;  %v21_v0 = vld [vmem:[#allocation2] sm:$0xff]  ;;  %s92_s18 = smov 1   ;;  %s93_s19 = smov [#allocation5]  }
  0x13   :  { %22 = vrot.lane.b32.xlu0 %v21_v0, %s92_s18  ;;  %s31_s20 = sshll.u32 %s93_s19, 4  ;;  %s32_s20 = int_to_ptr.vmem [resolvable:$true] %s31_s20 }
  0x14   :  { %s65_s21 = scalar_lea.vmem %s32_s20, 128  ;;  %p70_p9 = scmp.lt.s32.totalorder %s32_s20, %s32_s20 }
  0x15   :  { %p66_p8 = scmp.ne.s32.totalorder %s32_s20, %s65_s21  ;;  %p71_p10 = scmp.lt.s32.totalorder %s65_s21, %s65_s21 }
  0x17   :  { %p72_p11 = por %p71_p10, %p70_p9 }
  0x19   :  { %p73_p12 = pnand %p72_p11, %p66_p8 }
  0x85   :  { %v23_v1 = vpop.permute.xlu0 %22 }
  0x86   :  { %24 = vst [vmem:[#allocation5] sm:$0xff] %v23_v1 }
  0x87   :  { %76 = shalt.err (!%p73_p12)
}
  0x88   :  { %s77_s0 = scalar_lea.hbm %s129_s1, 128 }
  0x89   :  { %p78_p13 = scmp.ne.s32.totalorder %s129_s1, %s77_s0  ;;  %p81_p0 = scmp.lt.u32.totalorder %s77_s0, %s129_s1 }
  0x8b   :  { %p83_p1 = pnand %p81_p0, %p78_p13 }
  0x8d   :  { %86 = shalt.err (!%p83_p1)
}
  0x8e   :  { %34 = dma.vmem_to_hbm [thread:$0]  %s32_s20, 128, %s129_s1, [#allocation4]  }
  0x8f   :  { %89 = dma.done.wait [#allocation4], 128  }
  0x90   :  { %90 = vsyncadd [#allocation4], 4294967168 }
  0x91   :  { %38 = vsyncpa [#allocation3], 1 }
  0x92   :  { %39 = vsyncpa [#allocation4], 1 }

</bundles_post_ra>
